<compile_context>
chip_gen: v5e
topology: v5e:2x2
jax: 0.10.0
libtpu: 0.0.40
codegen_flags: <defaults>
</compile_context>

<pallas_src>
import functools

import jax
import jax.numpy as jnp
from jax.experimental import pallas as pl
from jax.experimental.pallas import tpu as pltpu


# -----------------------------------------------------------------------------
# Positional tables
# -----------------------------------------------------------------------------
def build_rel_pos(head_dim, seq_q, seq_k):
    """Full R[d, i, j] exactly as the PyTorch module builds it (reference only)."""
    pos = (jnp.arange(seq_q)[:, None] - jnp.arange(seq_k)[None, :]).astype(jnp.float32)
    n_even = (head_dim + 1) // 2
    n_odd = head_dim // 2
    i_even = jnp.arange(n_even, dtype=jnp.float32)
    i_odd = jnp.arange(n_odd, dtype=jnp.float32)
    freq_even = 10000.0 ** (-2.0 * i_even / head_dim)
    freq_odd = 10000.0 ** (-2.0 * i_odd / head_dim)
    R = jnp.zeros((head_dim, seq_q, seq_k), jnp.float32)
    R = R.at[0::2].set(jnp.sin(pos[None, :, :] * freq_even[:, None, None]))
    R = R.at[1::2].set(jnp.cos(pos[None, :, :] * freq_odd[:, None, None]))
    return R


def build_rel_trig(head_dim, seq_q, seq_k):
    """Compact trig tables so that, for qv = q_h + v_h,

         sum_d qv[i,d] * R[d,i,j]  ==  (qv*aq) @ ck^T + (qv*bq) @ sk^T

    using sin((i-j)w)=sin(iw)cos(jw)-cos(iw)sin(jw) (even d) and
          cos((i-j)w)=cos(iw)cos(jw)+sin(iw)sin(jw) (odd d).
    Shapes: aq,bq: (seq_q, hd);  ck,sk: (seq_k, hd).  No (hd,sq,sk) tensor.
    """
    d = jnp.arange(head_dim)
    m = (d // 2).astype(jnp.float32)                       # even 2m / odd 2m+1 share freq
    freq = 10000.0 ** (-2.0 * m / head_dim)                # (hd,)
    qpos = jnp.arange(seq_q, dtype=jnp.float32)[:, None]   # (sq, 1)
    kpos = jnp.arange(seq_k, dtype=jnp.float32)[:, None]   # (sk, 1)
    sin_q = jnp.sin(qpos * freq[None, :])
    cos_q = jnp.cos(qpos * freq[None, :])
    cos_k = jnp.cos(kpos * freq[None, :])
    sin_k = jnp.sin(kpos * freq[None, :])
    even = (d % 2 == 0)[None, :]
    aq = jnp.where(even, sin_q, cos_q)                     # coeff of cos(jw)
    bq = jnp.where(even, -cos_q, sin_q)                    # coeff of sin(jw)
    return aq, bq, cos_k, sin_k


# -----------------------------------------------------------------------------
# Kernels
# -----------------------------------------------------------------------------
def _kv_proj_kernel(key_ref, value_ref, wk_ref, wv_ref, kout_ref, vout_ref,
                    *, compute_dtype):
    """Fused per-head K/V projections as single model_dim-wide matmuls."""
    cd = compute_dtype
    kout_ref[...] = jnp.dot(key_ref[...].astype(cd), wk_ref[...].astype(cd),
                            preferred_element_type=jnp.float32)
    vout_ref[...] = jnp.dot(value_ref[...].astype(cd), wv_ref[...].astype(cd),
                            preferred_element_type=jnp.float32)


def _self_attention_kernel(q_ref, k_ref, v_ref, wq_ref, u_ref, vb_ref,
                           aq_ref, bq_ref, ckskt_ref, wo_ref, bo_ref,
                           out_ref, *, heads, head_dim, mask, scale,
                           q_tile, compute_dtype):
    cd = compute_dtype
    f32 = jnp.float32

    # Fused Q projection for this query tile: (tq, md) @ (md, md) on the MXU.
    q_all = jnp.dot(q_ref[...].astype(cd), wq_ref[...].astype(cd),
                    preferred_element_type=f32)                       # (tq, md)
    kp = k_ref[...]                                                   # (skl, md) f32
    vp = v_ref[...]                                                   # (skl, md) f32
    aq = aq_ref[...]                                                  # (tq, hd)
    bq = bq_ref[...]
    ckskt = ckskt_ref[...]                                            # (skl, 2hd)
    u_all = u_ref[...]                                                # (heads, hd)
    v_all = vb_ref[...]                                               # (heads, hd)

    # Fold head_dim^-0.5 into the small LHS operands (pre-matmul) instead of
    # scaling the full (tq, skl) score matrix per head.
    if scale:
        s = f32(head_dim ** -0.5)
        q_all = q_all * s
        u_all = u_all * s
        v_all = v_all * s

    tq = q_all.shape[0]
    skl = kp.shape[0]

    if mask:  # hoisted out of the head loop; global row index via program_id
        q0 = pl.program_id(0) * q_tile
        row = q0 + jax.lax.broadcasted_iota(jnp.int32, (tq, skl), 0)
        col = jax.lax.broadcasted_iota(jnp.int32, (tq, skl), 1)
        keep = row >= col

    ctxs = []
    for h in range(heads):
        lo, hi = h * head_dim, (h + 1) * head_dim
        q_h = q_all[:, lo:hi]                                          # (tq, hd)
        k_h = kp[:, lo:hi]                                             # (skl, hd)
        v_h = vp[:, lo:hi]

        qu = q_h + u_all[h:h + 1, :]        # fold global content bias u (UxK)
        qv = q_h + v_all[h:h + 1, :]        # fold position bias v into rel term

        # One MXU matmul per head: [QK^T | rel-cos | rel-sin] fused (K = 3*hd).
        lhs = jnp.concatenate([qu, qv * aq, qv * bq], axis=1)          # (tq, 3hd)
        rhs = jnp.concatenate([k_h, ckskt], axis=1)                    # (skl, 3hd)
        att = jax.lax.dot_general(lhs.astype(cd), rhs.astype(cd),
                                  (((1,), (1,)), ((), ())),
                                  preferred_element_type=f32)          # (tq, skl)

        if mask:   # causal: masked_fill(tril==0, -1e18); softmax zeros these out
            att = jnp.where(keep, att, f32(-1e18))

        # softmax over keys (f32); divide via EUP reciprocal
        mrow = jnp.max(att, axis=-1, keepdims=True)
        e = jnp.exp(att - mrow)
        ssum = jnp.sum(e, axis=-1, keepdims=True)
        p = e * pl.reciprocal(ssum, approx=True)

        ctxs.append(jnp.dot(p.astype(cd), v_h.astype(cd),
                            preferred_element_type=f32))               # (tq, hd)

    # head concat + single output Linear (K = model_dim matmul)
    ctx = jnp.concatenate(ctxs, axis=1)                                # (tq, md)
    out = jnp.dot(ctx.astype(cd), wo_ref[...].astype(cd),
                  preferred_element_type=f32) + bo_ref[...]
    out_ref[...] = out.astype(out_ref.dtype)


# -----------------------------------------------------------------------------
# Wrapper
# -----------------------------------------------------------------------------
def _pick_tile(n, candidates=(512, 256, 128)):
    for t in candidates:
        if n % t == 0:
            return t
    return n   # full extent (always legal as a block dim)


def self_attention(value, key_in, query, p, *, mask=False, scale=True,
                   compute_dtype=jnp.float32):
    """selfAttention.forward(value, key, query, scale, mask)."""
    heads, hd = p['u'].shape
    seq_q, md = query.shape
    seq_k = key_in.shape[0]
    assert value.shape[0] == seq_k

    # Fuse per-head projection weights into [model_dim, heads*hd] matmuls.
    wq_all = jnp.transpose(p['wq'], (1, 0, 2)).reshape(md, heads * hd)
    wk_all = jnp.transpose(p['wk'], (1, 0, 2)).reshape(md, heads * hd)
    wv_all = jnp.transpose(p['wv'], (1, 0, 2)).reshape(md, heads * hd)

    aq, bq, ck, skt = build_rel_trig(hd, seq_q, seq_k)
    ckskt = jnp.concatenate([ck, skt], axis=1)           # (seq_k, 2*hd), head-indep.

    # ---- Stage 1: K/V projections (shared by every query tile) --------------
    tk = _pick_tile(seq_k)
    kv_kernel = functools.partial(_kv_proj_kernel, compute_dtype=compute_dtype)
    k_proj, v_proj = pl.pallas_call(
        kv_kernel,
        out_shape=(jax.ShapeDtypeStruct((seq_k, md), jnp.float32),
                   jax.ShapeDtypeStruct((seq_k, md), jnp.float32)),
        grid_spec=pltpu.PrefetchScalarGridSpec(
            num_scalar_prefetch=0, grid=(seq_k // tk,),
            in_specs=[pl.BlockSpec((tk, md), lambda i: (i, 0)),
                      pl.BlockSpec((tk, md), lambda i: (i, 0)),
                      pl.BlockSpec((md, md), lambda i: (0, 0)),
                      pl.BlockSpec((md, md), lambda i: (0, 0))],
            out_specs=(pl.BlockSpec((tk, md), lambda i: (i, 0)),
                       pl.BlockSpec((tk, md), lambda i: (i, 0)))),
        compiler_params=pltpu.CompilerParams(
            dimension_semantics=("parallel",)),
    )(key_in, value, wk_all, wv_all)

    # ---- Stage 2: attention, grid over query-row tiles -----------------------
    tq = _pick_tile(seq_q)
    kernel = functools.partial(_self_attention_kernel, heads=heads, head_dim=hd,
                               mask=mask, scale=scale, q_tile=tq,
                               compute_dtype=compute_dtype)
    return pl.pallas_call(
        kernel,
        out_shape=jax.ShapeDtypeStruct((seq_q, md), jnp.float32),
        grid_spec=pltpu.PrefetchScalarGridSpec(
            num_scalar_prefetch=0, grid=(seq_q // tq,),
            in_specs=[pl.BlockSpec((tq, md), lambda i: (i, 0)),        # query tile
                      pl.BlockSpec((seq_k, md), lambda i: (0, 0)),     # K projected
                      pl.BlockSpec((seq_k, md), lambda i: (0, 0)),     # V projected
                      pl.BlockSpec((md, md), lambda i: (0, 0)),        # Wq fused
                      pl.BlockSpec((heads, hd), lambda i: (0, 0)),     # u
                      pl.BlockSpec((heads, hd), lambda i: (0, 0)),     # v
                      pl.BlockSpec((tq, hd), lambda i: (i, 0)),        # aq (query trig)
                      pl.BlockSpec((tq, hd), lambda i: (i, 0)),        # bq
                      pl.BlockSpec((seq_k, 2 * hd), lambda i: (0, 0)), # [cos|sin](j*w)
                      pl.BlockSpec((md, md), lambda i: (0, 0)),        # Wo
                      pl.BlockSpec((1, md), lambda i: (0, 0))],        # bo
            out_specs=pl.BlockSpec((tq, md), lambda i: (i, 0))),
        compiler_params=pltpu.CompilerParams(
            dimension_semantics=("parallel",)),
    )(query, k_proj, v_proj, wq_all, p['u'], p['v'], aq, bq, ckskt,
      p['wo'], p['bo'])


# -----------------------------------------------------------------------------
# Deterministic parameter init (shapes implied by the module __init__)
# -----------------------------------------------------------------------------
def init_attention_params(key, model_dim, heads):
    hd = model_dim // heads
    ks = jax.random.split(key, 7)
    return dict(
        wq=0.1 * jax.random.normal(ks[0], (heads, model_dim, hd), jnp.float32),
        wk=0.1 * jax.random.normal(ks[1], (heads, model_dim, hd), jnp.float32),
        wv=0.1 * jax.random.normal(ks[2], (heads, model_dim, hd), jnp.float32),
        u=jax.random.uniform(ks[3], (heads, hd), jnp.float32),
        v=jax.random.uniform(ks[4], (heads, hd), jnp.float32),
        wo=0.1 * jax.random.normal(ks[5], (model_dim, model_dim), jnp.float32),
        bo=0.1 * jax.random.normal(ks[6], (1, model_dim), jnp.float32),
    )


# -----------------------------------------------------------------------------
# Pure-JAX reference (mirrors the PyTorch forward, with the full R tensor)
# -----------------------------------------------------------------------------
def ref_self_attention(value, key_in, query, p, *, mask, scale):
    heads, hd = p['u'].shape
    R = build_rel_pos(hd, query.shape[0], key_in.shape[0])
    q = jnp.stack([query @ p['wq'][h] for h in range(heads)])
    k = jnp.stack([key_in @ p['wk'][h] for h in range(heads)])
    v = jnp.stack([value @ p['wv'][h] for h in range(heads)])
    kT = jnp.transpose(k, (0, 2, 1))
    att = jnp.einsum('lij,ljk->lik', q, kT)
    att = att + jnp.einsum('hid,dij->hij', q, R)
    att = att + jnp.einsum('hd,hdk->hk', p['u'], kT)[:, None, :]
    att = att + jnp.einsum('hd,dtj->htj', p['v'], R)
    if mask:
        tril = jnp.tril(jnp.ones_like(att))
        att = jnp.where(tril == 0, jnp.float32(-1e18), att)
    if scale:
        att = att * hd ** -0.5
    att = jax.nn.softmax(att, axis=2)
    out = jnp.einsum('lij,ljk->lik', att, v)
    out = jnp.concatenate([out[h] for h in range(heads)], axis=1)
    return out @ p['wo'] + p['bo']


# -----------------------------------------------------------------------------
if __name__ == "__main__":
    model_dim, heads, seq = 32, 2, 8
    root = jax.random.PRNGKey(0)
    kp, kv, kk, kq = jax.random.split(root, 4)
    params = init_attention_params(kp, model_dim, heads)
    value = jax.random.normal(kv, (seq, model_dim), jnp.float32)
    key_in = jax.random.normal(kk, (seq, model_dim), jnp.float32)
    query = jax.random.normal(kq, (seq, model_dim), jnp.float32)

    # 1) module defaults: scale=True, mask=False
    out = self_attention(value, key_in, query, params, mask=False, scale=True)
    out = jax.block_until_ready(out)
    ref = ref_self_attention(value, key_in, query, params, mask=False, scale=True)
    assert out.shape == (seq, model_dim), out.shape
    assert bool(jnp.all(jnp.isfinite(out)))
    assert bool(jnp.allclose(out, ref, rtol=5e-3, atol=5e-3)), \
        float(jnp.max(jnp.abs(out - ref)))

    # 2) causal-mask path
    out_m = jax.block_until_ready(
        self_attention(value, key_in, query, params, mask=True, scale=True))
    ref_m = ref_self_attention(value, key_in, query, params, mask=True, scale=True)
    assert bool(jnp.allclose(out_m, ref_m, rtol=5e-3, atol=5e-3)), \
        float(jnp.max(jnp.abs(out_m - ref_m)))

    # 3) cross-attention lengths (seq_q != seq_k)
    seq_k2 = 16
    v2 = jax.random.normal(jax.random.PRNGKey(1), (seq_k2, model_dim), jnp.float32)
    k2 = jax.random.normal(jax.random.PRNGKey(2), (seq_k2, model_dim), jnp.float32)
    out_c = jax.block_until_ready(
        self_attention(v2, k2, query, params, mask=False, scale=True))
    ref_c = ref_self_attention(v2, k2, query, params, mask=False, scale=True)
    assert bool(jnp.allclose(out_c, ref_c, rtol=5e-3, atol=5e-3)), \
        float(jnp.max(jnp.abs(out_c - ref_c)))

    # 4) mask=True, scale=False path
    out_ns = jax.block_until_ready(
        self_attention(value, key_in, query, params, mask=True, scale=False))
    ref_ns = ref_self_attention(value, key_in, query, params, mask=True, scale=False)
    assert bool(jnp.allclose(out_ns, ref_ns, rtol=5e-3, atol=5e-3)), \
        float(jnp.max(jnp.abs(out_ns - ref_ns)))

    # 5) bf16 MXU-operand fast path (v6e/v7x), f32 accumulation — loose check
    out_bf = jax.block_until_ready(
        self_attention(value, key_in, query, params, mask=False, scale=True,
                       compute_dtype=jnp.bfloat16))
    assert bool(jnp.all(jnp.isfinite(out_bf)))
    assert bool(jnp.allclose(out_bf, ref, rtol=1e-1, atol=1e-1)), \
        float(jnp.max(jnp.abs(out_bf - ref)))

    print("KERNEL_OK")
</pallas_src>

<mosaic_0001>
module attributes {stable_mosaic.version = 11 : i64} {
  func.func @_kv_proj_kernel(%arg0: i32, %arg1: memref<8x32xf32, #tpu.memory_space<vmem>>, %arg2: memref<8x32xf32, #tpu.memory_space<vmem>>, %arg3: memref<32x32xf32, #tpu.memory_space<vmem>>, %arg4: memref<32x32xf32, #tpu.memory_space<vmem>>, %arg5: memref<8x32xf32, #tpu.memory_space<vmem>>, %arg6: memref<8x32xf32, #tpu.memory_space<vmem>>) attributes {dimension_semantics = [#tpu.dimension_semantics<parallel>], iteration_bounds = array<i64: 1>, scalar_prefetch = 0 : i64, scratch_operands = 0 : i64, tpu.core_type = #tpu.core_type<tc>, window_params = [{transform_indices = @transform_0, window_bounds = array<i64: 8, 32>}, {transform_indices = @transform_1, window_bounds = array<i64: 8, 32>}, {pipeline_mode = #tpu.pipeline_mode<synchronous>, transform_indices = @transform_2, window_bounds = array<i64: 32, 32>}, {pipeline_mode = #tpu.pipeline_mode<synchronous>, transform_indices = @transform_3, window_bounds = array<i64: 32, 32>}, {transform_indices = @transform_4, window_bounds = array<i64: 8, 32>}, {transform_indices = @transform_5, window_bounds = array<i64: 8, 32>}]} {
    %c0 = arith.constant 0 : index
    %c0_0 = arith.constant 0 : index
    %0 = vector.load %arg1[%c0, %c0_0] : memref<8x32xf32, #tpu.memory_space<vmem>>, vector<8x32xf32>
    %c0_1 = arith.constant 0 : index
    %c0_2 = arith.constant 0 : index
    %1 = vector.load %arg3[%c0_1, %c0_2] : memref<32x32xf32, #tpu.memory_space<vmem>>, vector<32x32xf32>
    %cst = arith.constant dense<0.000000e+00> : vector<8x32xf32>
    %2 = tpu.matmul %0, %1, %cst {dimension_numbers = #tpu.dot_dimension_numbers<[1], [0], [0], [1], [0, 0, 1, 1], [], []>} : vector<8x32xf32>, vector<32x32xf32>, vector<8x32xf32> -> vector<8x32xf32>
    %c0_3 = arith.constant 0 : index
    %c0_4 = arith.constant 0 : index
    %3 = vector.load %arg5[%c0_3, %c0_4] : memref<8x32xf32, #tpu.memory_space<vmem>>, vector<8x32xf32>
    tpu.vector_store %arg5[%c0_3, %c0_4], %2 {strides = array<i32>} : memref<8x32xf32, #tpu.memory_space<vmem>>, vector<8x32xf32>,
    %c0_5 = arith.constant 0 : index
    %c0_6 = arith.constant 0 : index
    %4 = vector.load %arg2[%c0_5, %c0_6] : memref<8x32xf32, #tpu.memory_space<vmem>>, vector<8x32xf32>
    %c0_7 = arith.constant 0 : index
    %c0_8 = arith.constant 0 : index
    %5 = vector.load %arg4[%c0_7, %c0_8] : memref<32x32xf32, #tpu.memory_space<vmem>>, vector<32x32xf32>
    %cst_9 = arith.constant dense<0.000000e+00> : vector<8x32xf32>
    %6 = tpu.matmul %4, %5, %cst_9 {dimension_numbers = #tpu.dot_dimension_numbers<[1], [0], [0], [1], [0, 0, 1, 1], [], []>} : vector<8x32xf32>, vector<32x32xf32>, vector<8x32xf32> -> vector<8x32xf32>
    %c0_10 = arith.constant 0 : index
    %c0_11 = arith.constant 0 : index
    %7 = vector.load %arg6[%c0_10, %c0_11] : memref<8x32xf32, #tpu.memory_space<vmem>>, vector<8x32xf32>
    tpu.vector_store %arg6[%c0_10, %c0_11], %6 {strides = array<i32>} : memref<8x32xf32, #tpu.memory_space<vmem>>, vector<8x32xf32>,
    return
  }
  func.func @transform_0(%arg0: i32) -> (i32, i32) {
    %c0_i32 = arith.constant 0 : i32
    %c0_i32_0 = arith.constant 0 : i32
    return %arg0, %c0_i32 : i32, i32
  }
  func.func @transform_1(%arg0: i32) -> (i32, i32) {
    %c0_i32 = arith.constant 0 : i32
    %c0_i32_0 = arith.constant 0 : i32
    return %arg0, %c0_i32 : i32, i32
  }
  func.func @transform_2(%arg0: i32) -> (i32, i32) {
    %c0_i32 = arith.constant 0 : i32
    %c0_i32_0 = arith.constant 0 : i32
    %c0_i32_1 = arith.constant 0 : i32
    return %c0_i32, %c0_i32_0 : i32, i32
  }
  func.func @transform_3(%arg0: i32) -> (i32, i32) {
    %c0_i32 = arith.constant 0 : i32
    %c0_i32_0 = arith.constant 0 : i32
    %c0_i32_1 = arith.constant 0 : i32
    return %c0_i32, %c0_i32_0 : i32, i32
  }
  func.func @transform_4(%arg0: i32) -> (i32, i32) {
    %c0_i32 = arith.constant 0 : i32
    %c0_i32_0 = arith.constant 0 : i32
    return %arg0, %c0_i32 : i32, i32
  }
  func.func @transform_5(%arg0: i32) -> (i32, i32) {
    %c0_i32 = arith.constant 0 : i32
    %c0_i32_0 = arith.constant 0 : i32
    return %arg0, %c0_i32 : i32, i32
  }
}

</mosaic_0001>

<bundles_post_ra>
// kernel: tpu_custom_call.1
= control target key start
LH: loop header
LB: loop body
LE: loop exit
PB: predicated region body
PF: predicated region fallthrough
CT: control target
= control target key end

     0   :  { %11 = vsyncpa [#allocation3], 0  ;;  %s398_s0 = inlined_call_operand.hbm [shape: f32[8,32], index: 0, kind: input, shape index: {}]   ;;  %s399_s1 = inlined_call_operand.hbm [shape: f32[8,32], index: 1, kind: input, shape index: {}]   ;;  %s400_s2 = inlined_call_operand.hbm [shape: f32[32,32], index: 2, kind: input, shape index: {}]   ;;  %s401_s3 = inlined_call_operand.hbm [shape: f32[32,32], index: 3, kind: input, shape index: {}]   ;;  %s402_s4 = inlined_call_operand.hbm [shape: f32[8,32], index: 4, kind: output, shape index: {0}]   ;;  %s403_s5 = inlined_call_operand.hbm [shape: f32[8,32], index: 5, kind: output, shape index: {1}]  }
   0x1   :  { %12 = vsyncpa [#allocation6], 0 }
   0x2   :  { %13 = vsyncpa [#allocation9], 0 }
   0x3   :  { %14 = vsyncpa [#allocation4], 0  ;;  %s32_s20 = sshll.u32 %s399_s1, 4  ;;  %s33_s20 = int_to_ptr.hbm [resolvable:$true] %s32_s20 }
   0x4   :  { %15 = vsyncpa [#allocation12], 0  ;;  %s338_s21 = smov [#allocation5]   ;;  %s21_s25 = sshll.u32 %s398_s0, 4  ;;  %s22_s25 = int_to_ptr.hbm [resolvable:$true] %s21_s25 }
   0x5   :  { %s34_s22 = sshll.u32 %s338_s21, 4  ;;  %s339_s26 = smov [#allocation2]   ;;  %s35_s22 = int_to_ptr.vmem [resolvable:$true] %s34_s22 }
   0x6   :  { %37 = dma.hbm_to_vmem [thread:$0]  %s33_s20, 128, %s35_s22, [#allocation6]  }
   0x7   :  { %s23_s27 = sshll.u32 %s339_s26, 4  ;;  %s42_s30 = sshll.u32 %s400_s2, 4  ;;  %s24_s27 = int_to_ptr.vmem [resolvable:$true] %s23_s27  ;;  %s43_s30 = int_to_ptr.hbm [resolvable:$true] %s42_s30 }
   0x8   :  { %26 = dma.hbm_to_vmem [thread:$0]  %s22_s25, 128, %s24_s27, [#allocation3]  }
   0x9   :  { %s340_s1 = smov [#allocation7]   ;;  %s55_s9 = sshll.u32 %s401_s3, 4  ;;  %s56_s9 = int_to_ptr.hbm [resolvable:$true] %s55_s9 }
   0xa   :  { %s44_s6 = sshll.u32 %s340_s1, 4  ;;  %s341_s10 = smov 128   ;;  %s45_s6 = int_to_ptr.vmem [resolvable:$true] %s44_s6 }
   0xb   :  { %s342_s0 = smov 8   ;;  %s343_s11 = smov [#allocation8]  }
   0xc   :  { %50 = dma.hbm_to_vmem [thread:$0]  %s43_s30, 512, %s45_s6, [#allocation6], %s341_s10, %s341_s10, %s342_s0  }
   0xd   :  { %s57_s12 = sshll.u32 %s343_s11, 4  ;;  %s58_s12 = int_to_ptr.vmem [resolvable:$true] %s57_s12 }
   0xe   :  { %63 = dma.hbm_to_vmem [thread:$0]  %s56_s9, 512, %s58_s12, [#allocation9], %s341_s10, %s341_s10, %s342_s0  }
   0xf   :  { %328 = dma.done.wait [#allocation3], 128  }
  0x10   :  { %329 = vsyncadd [#allocation3], 4294967168 }
  0x11   :  { %330 = dma.done.wait [#allocation6], 640  }
  0x12   :  { %331 = vsyncadd [#allocation6], 4294966656 }
  0x13   :  { %332 = dma.done.wait [#allocation9], 512  }
  0x14   :  { %333 = vsyncadd [#allocation9], 4294966784  ;;  %v84_v0 = vld [vmem:[#allocation7 + $0x18] sm:$0xff]  ;;  %v83_v2 = vld [vmem:[#allocation7 + $0x10] sm:$0xff]  ;;  %vm85_vm0 = vcmask 261120   ;;  %s344_s2 = smov [#allocation10]  }
  0x15   :  { %v114_v1 = vld [vmem:[#allocation8 + $0x18] sm:$0xff]  ;;  %101 = vmatpush.msra.mxu0 %v84_v0  ;;  %v113_v3 = vld [vmem:[#allocation8 + $0x10] sm:$0xff]  ;;  %v82_v4 = vld [vmem:[#allocation7 + $0x8] sm:$0xff]  ;;  %s144_s3 = sshll.u32 %s344_s2, 4  ;;  %s146_s15 = sshll.u32 %s402_s4, 4  ;;  %s145_s3 = int_to_ptr.vmem [resolvable:$true] %s144_s3  ;;  %s147_s15 = int_to_ptr.hbm [resolvable:$true] %s146_s15 }
  0x16   :  { %130 = vmatpush.msra.mxu1 %v114_v1  ;;  %v112_v5 = vld [vmem:[#allocation8 + $0x8] sm:$0xff]  ;;  %v81_v6 = vld [vmem:[#allocation7] sm:$0xff]  ;;  %v80_v8 = vld [vmem:[#allocation2] sm:$0xff]  ;;  %s345_s16 = smov [#allocation11]   ;;  %s157_s20 = sshll.u32 %s403_s5, 4  ;;  %s158_s20 = int_to_ptr.hbm [resolvable:$true] %s157_s20 }
  0x17   :  { %102 = vmatpush.msra.mxu0 %v83_v2  ;;  %v111_v7 = vld [vmem:[#allocation8] sm:$0xff]  ;;  %v110_v9 = vld [vmem:[#allocation5] sm:$0xff]  ;;  %s155_s17 = sshll.u32 %s345_s16, 4  ;;  %s156_s17 = int_to_ptr.vmem [resolvable:$true] %s155_s17 }
  0x18   :  { %131 = vmatpush.msra.mxu1 %v113_v3 }
  0x19   :  { %103 = vmatpush.msra.mxu0 %v82_v4 }
  0x1a   :  { %132 = vmatpush.msra.mxu1 %v112_v5 }
  0x1b   :  { %104 = vmatpush.msra.mxu0 %v81_v6 }
  0x1c   :  { %133 = vmatpush.msra.mxu1 %v111_v7  ;;  %174 = vmatmul.msk.f32.vlgmr.msra.gmra.mxu0 %vm85_vm0, %v80_v8 }
  0x1d   :  { %175 = vmatmul.msk.f32.vlgmr.msra.gmra.mxu1 %vm85_vm0, %v110_v9 }
  0x99   :  { %v106_v10 = vpop.f32.mrf.mxu0 }
  0x9a   :  { %v135_v11 = vpop.f32.mrf.mxu1  ;;  %109 = vst.msk [vmem:[#allocation10] sm:$0xff] %vm85_vm0, %v106_v10 }
  0x9b   :  { %138 = vst.msk [vmem:[#allocation11] sm:$0xff] %vm85_vm0, %v135_v11  ;;  %149 = dma.vmem_to_hbm [thread:$0]  %s145_s3, 128, %s147_s15, [#allocation4]  }
  0x9c   :  { %160 = dma.vmem_to_hbm [thread:$0]  %s156_s17, 128, %s158_s20, [#allocation12]  }
  0x9d   :  { %334 = dma.done.wait [#allocation4], 128  }
  0x9e   :  { %335 = vsyncadd [#allocation4], 4294967168 }
  0x9f   :  { %336 = dma.done.wait [#allocation12], 128  }
  0xa0   :  { %337 = vsyncadd [#allocation12], 4294967168 }
  0xa1   :  { %169 = vsyncpa [#allocation3], 1 }
  0xa2   :  { %170 = vsyncpa [#allocation6], 1 }
  0xa3   :  { %171 = vsyncpa [#allocation9], 1 }
  0xa4   :  { %172 = vsyncpa [#allocation4], 1 }
  0xa5   :  { %173 = vsyncpa [#allocation12], 1 }

</bundles_post_ra>
